<compile_context>
chip_gen: v6e
topology: v6e:2x2x1
jax: 0.10.0
libtpu: 0.0.40
codegen_flags: <defaults>
</compile_context>

<pallas_src>
import functools

import jax
import jax.numpy as jnp
from jax.experimental import pallas as pl
from jax.experimental.pallas import tpu as pltpu


def _leaky_softplus_math(x_f32, alpha):
    # Numerically stable logaddexp(x, 0) = max(x, 0) + log1p(exp(-|x|)),
    # matching torch.logaddexp(input, zeros_like(input)).
    softplus = jnp.maximum(x_f32, 0.0) + jnp.log1p(jnp.exp(-jnp.abs(x_f32)))
    return alpha * x_f32 + (1.0 - alpha) * softplus


def _leaky_softplus_kernel(x_ref, o_ref, *, alpha):
    # Upcast to f32 so exp/log1p run at full precision on every generation.
    x = x_ref[...].astype(jnp.float32)
    o_ref[...] = _leaky_softplus_math(x, alpha).astype(o_ref.dtype)


def leaky_softplus(x, alpha: float = 0.2, *, target_block_bytes: int = 4 << 20):
    """Elementwise LeakySoftPlus(x) = alpha*x + (1-alpha)*log(1+exp(x))."""
    orig_shape = x.shape
    dtype = x.dtype
    n = x.size
    alpha = float(alpha)

    if n == 0:
        return x  # nothing to do; avoids a zero-sized grid

    itemsize = jnp.dtype(dtype).itemsize
    # Minimum sublane multiple: (8,128) f32, (16,128) bf16, (32,128) int8/fp8.
    sublane = max(8, 32 // itemsize)

    # Pick the widest lane-dense last dim that divides n exactly (free reshape,
    # long contiguous DMAs, unmasked wide stores).
    lanes = None
    for cand in (1024, 512, 256, 128):
        if n >= cand and n % cand == 0:
            lanes = cand
            break

    if lanes is None:
        # Ragged size: run the kernel on the aligned head and compute the
        # (<128-element) tail with plain jnp, then stitch.  Avoids the old
        # jnp.pad + trailing-slice path which copied the whole array twice.
        flat = x.reshape(-1)
        m = (n // 128) * 128
        tail = _leaky_softplus_math(flat[m:].astype(jnp.float32), alpha).astype(dtype)
        if m == 0:
            return tail.reshape(orig_shape)
        head = leaky_softplus(flat[:m], alpha, target_block_bytes=target_block_bytes)
        return jnp.concatenate([head.reshape(-1), tail]).reshape(orig_shape)

    rows = n // lanes
    x2d = x.reshape(rows, lanes)

    # Tile-row selection: ~target_block_bytes per tile (multi-MiB -> near HBM
    # roofline), >= 4 grid steps when rows allow (pipeline steady state, and
    # >= 2 tiles per TensorCore on v7x), rounded to the dtype's sublane tile.
    target_rows = max(sublane, target_block_bytes // (lanes * itemsize))
    if rows >= 4 * sublane:
        block_rows = min(target_rows, rows // 4)
        block_rows = max(sublane, (block_rows // sublane) * sublane)
        # Nudge towards an even step count so v7x's two TensorCores stay balanced.
        steps = pl.cdiv(rows, block_rows)
        if steps % 2 == 1:
            cand_rows = pl.cdiv(rows, steps + 1)
            cand_rows = ((cand_rows + sublane - 1) // sublane) * sublane
            cand_rows = max(sublane, min(cand_rows, block_rows))
            if pl.cdiv(rows, cand_rows) % 2 == 0:
                block_rows = cand_rows
    elif rows >= 2 * sublane:
        block_rows = max(sublane, ((rows // 2) // sublane) * sublane)
    else:
        # Tiny input: single full-extent block (full-dim blocks are always legal).
        block_rows = rows
    grid = (pl.cdiv(rows, block_rows),)

    out = pl.pallas_call(
        functools.partial(_leaky_softplus_kernel, alpha=alpha),
        out_shape=jax.ShapeDtypeStruct((rows, lanes), dtype),
        grid_spec=pltpu.PrefetchScalarGridSpec(
            num_scalar_prefetch=0,
            grid=grid,
            in_specs=[pl.BlockSpec((block_rows, lanes), lambda i: (i, 0))],
            out_specs=pl.BlockSpec((block_rows, lanes), lambda i: (i, 0)),
        ),
        compiler_params=pltpu.CompilerParams(
            dimension_semantics=("parallel",),
            # 2 arrays x 2 buffers x ~4 MiB tile ~= 16 MiB footprint.  48 MiB
            # leaves headroom for Mosaic internal scratch and stays under
            # v7x's 64 MiB per-TC VMEM (v5e/v6e have 128 MiB physical VMEM).
            vmem_limit_bytes=48 * 1024 * 1024,
        ),
    )(x2d)

    return out.reshape(orig_shape)


def _reference(x, alpha):
    return alpha * x + (1.0 - alpha) * jnp.logaddexp(x, jnp.zeros_like(x))


if __name__ == "__main__":
    key = jax.random.PRNGKey(0)
    alpha = 0.2

    # Main test: small NCHW-ish shape consistent with typical usage.
    x = jax.random.normal(key, (2, 4, 16, 16), dtype=jnp.float32)
    y = jax.block_until_ready(leaky_softplus(x, alpha=alpha))
    assert y.shape == x.shape and y.dtype == x.dtype
    assert jnp.allclose(y, _reference(x, alpha), atol=1e-6, rtol=1e-6)

    # Ragged-size test: exercises the head(kernel)+tail(jnp) stitch path.
    xr = jax.random.normal(jax.random.PRNGKey(1), (257,), dtype=jnp.float32)
    yr = jax.block_until_ready(leaky_softplus(xr, alpha=alpha))
    assert yr.shape == xr.shape and yr.dtype == xr.dtype
    assert jnp.allclose(yr, _reference(xr, alpha), atol=1e-6, rtol=1e-6)

    print("KERNEL_OK")
</pallas_src>

<mosaic_0001>
module attributes {stable_mosaic.version = 11 : i64} {
  func.func @_leaky_softplus_kernel(%arg0: i32, %arg1: memref<2x1024xf32, #tpu.memory_space<vmem>>, %arg2: memref<2x1024xf32, #tpu.memory_space<vmem>>) attributes {dimension_semantics = [#tpu.dimension_semantics<parallel>], iteration_bounds = array<i64: 1>, scalar_prefetch = 0 : i64, scratch_operands = 0 : i64, tpu.core_type = #tpu.core_type<tc>, window_params = [{transform_indices = @transform_0, window_bounds = array<i64: 2, 1024>}, {transform_indices = @transform_1, window_bounds = array<i64: 2, 1024>}]} {
    %c0 = arith.constant 0 : index
    %c0_0 = arith.constant 0 : index
    %0 = vector.load %arg1[%c0, %c0_0] : memref<2x1024xf32, #tpu.memory_space<vmem>>, vector<2x1024xf32>
    %cst = arith.constant 0.000000e+00 : f32
    %1 = vector.broadcast %cst : f32 to vector<2x1024xf32>
    %2 = arith.maximumf %0, %1 : vector<2x1024xf32>
    %3 = math.absf %0 : vector<2x1024xf32>
    %cst_1 = arith.constant 0.000000e+00 : f32
    %4 = vector.broadcast %cst_1 : f32 to vector<2x1024xf32>
    %5 = arith.subf %4, %3 : vector<2x1024xf32>
    %6 = math.exp %5 : vector<2x1024xf32>
    %7 = math.log1p %6 : vector<2x1024xf32>
    %8 = arith.addf %2, %7 : vector<2x1024xf32>
    %cst_2 = arith.constant 2.000000e-01 : f32
    %9 = vector.broadcast %cst_2 : f32 to vector<2x1024xf32>
    %10 = arith.mulf %9, %0 : vector<2x1024xf32>
    %cst_3 = arith.constant 8.000000e-01 : f32
    %11 = vector.broadcast %cst_3 : f32 to vector<2x1024xf32>
    %12 = arith.mulf %11, %8 : vector<2x1024xf32>
    %13 = arith.addf %10, %12 : vector<2x1024xf32>
    %c0_4 = arith.constant 0 : index
    %c0_5 = arith.constant 0 : index
    %14 = vector.load %arg2[%c0_4, %c0_5] : memref<2x1024xf32, #tpu.memory_space<vmem>>, vector<2x1024xf32>
    tpu.vector_store %arg2[%c0_4, %c0_5], %13 {strides = array<i32>} : memref<2x1024xf32, #tpu.memory_space<vmem>>, vector<2x1024xf32>,
    return
  }
  func.func @transform_0(%arg0: i32) -> (i32, i32) {
    %c0_i32 = arith.constant 0 : i32
    %c0_i32_0 = arith.constant 0 : i32
    return %arg0, %c0_i32 : i32, i32
  }
  func.func @transform_1(%arg0: i32) -> (i32, i32) {
    %c0_i32 = arith.constant 0 : i32
    %c0_i32_0 = arith.constant 0 : i32
    return %arg0, %c0_i32 : i32, i32
  }
}

</mosaic_0001>

<bundles_post_ra>
// kernel: tpu_custom_call.1
= control target key start
LH: loop header
LB: loop body
LE: loop exit
PB: predicated region body
PF: predicated region fallthrough
CT: control target
= control target key end

     0   :  { %6 = vsyncpa [#allocation3], 0  ;;  %s148_s0 = inlined_call_operand.hbm [shape: f32[2,1024], index: 0, kind: input, shape index: {}]   ;;  %s149_s1 = inlined_call_operand.hbm [shape: f32[2,1024], index: 1, kind: output, shape index: {}]  }
   0x1   :  { %7 = vsyncpa [#allocation4], 0  ;;  %s130_s6 = smov [#allocation2]  }
   0x2   :  { %s14_s7 = sshll.u32 %s130_s6, 4  ;;  %s15_s7 = int_to_ptr.vmem [resolvable:$true] %s14_s7 }
   0x3   :  { %s94_s8 = scalar_lea.vmem %s15_s7, 256  ;;  %p99_p1 = scmp.lt.s32.totalorder %s15_s7, %s15_s7 }
   0x4   :  { %p95_p0 = scmp.ne.s32.totalorder %s15_s7, %s94_s8  ;;  %p100_p2 = scmp.lt.s32.totalorder %s94_s8, %s94_s8 }
   0x6   :  { %p101_p3 = por %p100_p2, %p99_p1 }
   0x8   :  { %p102_p4 = pnand %p101_p3, %p95_p0 }
   0xa   :  { %105 = shalt.err (!%p102_p4)
}
   0xb   :  { %17 = dma.hbm_to_vmem [thread:$0]  %s148_s0, 256, %s15_s7, [#allocation3]  }
   0xc   :  { %126 = dma.done.wait [#allocation3], 256  }
   0xd   :  { %127 = vsyncadd [#allocation3], 4294967040  ;;  %v21_v0 = vld [vmem:[#allocation2] sm:$0xff]  ;;  %v22_v1 = vld [vmem:[#allocation2 + $0x8] sm:$0xff]  ;;  %s131_s0 = smov [#allocation5]  }
   0xe   :  { %v25_v2 = vand.u32 2147483647, %v21_v0  ;;  %v26_v3 = vand.u32 2147483647, %v22_v1  ;;  %v23_v20 = vmax.f32 %v21_v0, 0.0  ;;  %v24_v24 = vmax.f32 %v22_v1, 0.0 }
   0xf   :  { %v53_v28 = vmul.f32 0.2, %v21_v0  ;;  %v54_v31 = vmul.f32 0.2, %v22_v1  ;;  %s67_s11 = sshll.u32 %s131_s0, 4  ;;  %s68_s11 = int_to_ptr.vmem [resolvable:$true] %s67_s11 }
  0x10   :  { %v27_v4 = vsub.f32 0.0, %v25_v2  ;;  %v28_v5 = vsub.f32 0.0, %v26_v3  ;;  %s106_s12 = scalar_lea.vmem %s68_s11, 256  ;;  %p111_p6 = scmp.lt.s32.totalorder %s68_s11, %s68_s11 }
  0x11   :  { %p107_p5 = scmp.ne.s32.totalorder %s68_s11, %s106_s12  ;;  %p112_p7 = scmp.lt.s32.totalorder %s106_s12, %s106_s12 }
  0x12   :  { %v29_v6 = vmul.f32 1.442695, %v27_v4  ;;  %v31_v7 = vmul.f32 1.442695, %v28_v5 }
  0x13   :  { %p113_p8 = por %p112_p7, %p111_p6 }
  0x14   :  { %78 = vpow2.f32 %v29_v6 }
  0x15   :  { %80 = vpow2.f32 %v31_v7  ;;  %p114_p9 = pnand %p113_p8, %p107_p5 }
  0x21   :  { %v79_v8 = vpop.eup %78 }
  0x22   :  { %v81_v9 = vpop.eup %80  ;;  %v33_v10 = vadd.f32 1.0, %v79_v8  ;;  %v36_v12 = vmul.f32 -0.5, %v79_v8  ;;  %v39_v15 = vand.u32 2147483647, %v79_v8 }
  0x23   :  { %v42_v11 = vadd.f32 1.0, %v81_v9  ;;  %v45_v13 = vmul.f32 -0.5, %v81_v9  ;;  %v48_v17 = vand.u32 2147483647, %v81_v9 }
  0x24   :  { %82 = vlog2.f32 %v33_v10  ;;  %v37_v14 = vadd.f32 1.0, %v36_v12  ;;  %vm40_vm0 = vcmp.lt.f32.partialorder %v39_v15, 0.0004427343 }
  0x25   :  { %84 = vlog2.f32 %v42_v11  ;;  %v46_v16 = vadd.f32 1.0, %v45_v13  ;;  %vm49_vm1 = vcmp.lt.f32.partialorder %v48_v17, 0.0004427343 }
  0x26   :  { %v38_v18 = vmul.f32 %v79_v8, %v37_v14 }
  0x27   :  { %v47_v21 = vmul.f32 %v81_v9, %v46_v16 }
  0x31   :  { %v83_v19 = vpop.eup %82 }
  0x32   :  { %v85_v22 = vpop.eup %84  ;;  %v35_v23 = vmul.f32 0.6931472, %v83_v19 }
  0x33   :  { %v44_v25 = vmul.f32 0.6931472, %v85_v22 }
  0x34   :  { %v41_v26 = vsel %vm40_vm0, %v38_v18, %v35_v23 }
  0x35   :  { %v51_v27 = vadd.f32 %v41_v26, %v23_v20  ;;  %v50_v29 = vsel %vm49_vm1, %v47_v21, %v44_v25 }
  0x36   :  { %v52_v30 = vadd.f32 %v50_v29, %v24_v24 }
  0x37   :  { %v55_v32 = vmul.f32 0.8, %v51_v27 }
  0x38   :  { %v56_v33 = vmul.f32 0.8, %v52_v30 }
  0x39   :  { %v57_v34 = vadd.f32 %v55_v32, %v53_v28 }
  0x3a   :  { %v58_v35 = vadd.f32 %v56_v33, %v54_v31 }
  0x3b   :  { %59 = vst [vmem:[#allocation5] sm:$0xff] %v57_v34 }
  0x3c   :  { %60 = vst [vmem:[#allocation5 + $0x8] sm:$0xff] %v58_v35 }
  0x3d   :  { %117 = shalt.err (!%p114_p9)
}
  0x3e   :  { %70 = dma.vmem_to_hbm [thread:$0]  %s68_s11, 256, %s149_s1, [#allocation4]  }
  0x3f   :  { %128 = dma.done.wait [#allocation4], 256  }
  0x40   :  { %129 = vsyncadd [#allocation4], 4294967040 }
  0x41   :  { %74 = vsyncpa [#allocation3], 1 }
  0x42   :  { %75 = vsyncpa [#allocation4], 1 }

</bundles_post_ra>
